<compile_context>
chip_gen: v6e
topology: v6e:2x2x1
jax: 0.10.0
libtpu: 0.0.40
codegen_flags: <defaults>
</compile_context>

<pallas_src>
import jax
import jax.numpy as jnp
from jax.experimental import pallas as pl
from jax.experimental.pallas import tpu as pltpu

D_IN = 256
D_HID = 256
OUT_LANES = 128  # lane-dense output block width


def classifier_kernel(x_ref, w1_ref, b1_ref, w2_ref, b2_ref, o_ref):
    # fc1: (TB, 256) @ (256, 256) on the MXU, bf16 inputs, f32 accumulate.
    h = jnp.dot(x_ref[...], w1_ref[...], preferred_element_type=jnp.float32)
    h = jnp.maximum(h + b1_ref[...], 0.0)  # bias + ReLU in f32 (VPU)
    # fc2 has out_features == 1: a (256,1) MXU matmul would use 1/128 of the
    # result columns, so do it as a VPU multiply + XLU lane reduction instead.
    out = jnp.sum(h * w2_ref[...], axis=-1, keepdims=True) + b2_ref[...]  # (TB, 1)
    # Lane-dense store: replicate across 128 lanes (unmasked vst); the wrapper
    # slices column 0 back out.
    o_ref[...] = jnp.broadcast_to(out, o_ref.shape).astype(o_ref.dtype)


def prepare_params(w1, b1, w2, b2):
    """One-time weight prep (hoisted out of the per-call path).
    w1: (256, 256) torch layout (out, in);  b1: (256,)
    w2: (1, 256)   torch layout (out, in);  b2: (1,)
    """
    w1_t = jnp.transpose(w1).astype(jnp.bfloat16)       # (in, out), bf16 MXU path
    b1_2d = b1.reshape(1, D_HID).astype(jnp.float32)    # (1, 256)
    w2_row = w2.reshape(1, D_HID).astype(jnp.float32)   # (1, 256) lane row for fc2
    b2_2d = b2.reshape(1, 1).astype(jnp.float32)        # (1, 1)
    return w1_t, b1_2d, w2_row, b2_2d


def _batch_tile(B):
    # 2 bufs * TB*256*2B (x, bf16) + 2 bufs * TB*128*4B (out, f32) + ~130 KiB
    # resident weights ~= 4.3 MiB at TB=2048 -> fits v7x's 64 MiB VMEM / 32 MiB
    # default scoped limit with plenty of headroom.
    if B >= 2048:
        return 2048
    return max(16, ((B + 15) // 16) * 16)  # multiple of 16 for bf16 sublane packing


def classifier_forward(x_nchw, w1_t, b1_2d, w2_row, b2_2d):
    """x_nchw: (B, C, H, W) with C*H*W == 256. Returns (B, 1) float32."""
    B = x_nchw.shape[0]
    x2d = x_nchw.reshape(B, D_IN).astype(jnp.bfloat16)  # == torch.flatten(x, 1)

    TB = _batch_tile(B)
    grid = (pl.cdiv(B, TB),)

    out_wide = pl.pallas_call(
        classifier_kernel,
        out_shape=jax.ShapeDtypeStruct((B, OUT_LANES), jnp.float32),
        grid=grid,
        in_specs=[
            pl.BlockSpec((TB, D_IN), lambda i: (i, 0)),      # x tile (pipelined)
            pl.BlockSpec((D_IN, D_HID), lambda i: (0, 0)),   # w1, VMEM-resident
            pl.BlockSpec((1, D_HID), lambda i: (0, 0)),      # b1, VMEM-resident
            pl.BlockSpec((1, D_HID), lambda i: (0, 0)),      # w2 row, VMEM-resident
            pl.BlockSpec((1, 1), lambda i: (0, 0)),          # b2, VMEM-resident
        ],
        out_specs=pl.BlockSpec((TB, OUT_LANES), lambda i: (i, 0)),
        compiler_params=pltpu.CompilerParams(
            dimension_semantics=("parallel",)),              # shard over 2 TCs on v7x
    )(x2d, w1_t, b1_2d, w2_row, b2_2d)

    return out_wide[:, :1]


def init_params(key):
    """Deterministic synthetic parameters with the shapes from __init__."""
    k1, k2, k3, k4 = jax.random.split(key, 4)
    # nn.Linear default init range: U(-1/sqrt(fan_in), 1/sqrt(fan_in))
    bound = 1.0 / (256.0 ** 0.5)
    w1 = jax.random.uniform(k1, (256, 256), jnp.float32, -bound, bound)
    b1 = jax.random.uniform(k2, (256,), jnp.float32, -bound, bound)
    w2 = jax.random.uniform(k3, (1, 256), jnp.float32, -bound, bound)
    b2 = jax.random.uniform(k4, (1,), jnp.float32, -bound, bound)
    return w1, b1, w2, b2


if __name__ == "__main__":
    key = jax.random.PRNGKey(0)
    k_x, k_p = jax.random.split(key)

    # (B, C, H, W) = (2, 4, 8, 8) -> flatten(1) gives 256 features, as fc1 expects.
    x = jax.random.normal(k_x, (2, 4, 8, 8), dtype=jnp.float32)
    w1, b1, w2, b2 = init_params(k_p)

    params = prepare_params(w1, b1, w2, b2)  # hoisted one-time weight transpose/cast
    fwd = jax.jit(classifier_forward)
    out = jax.block_until_ready(fwd(x, *params))

    # Reference in plain f32 JAX (bf16 matmul inputs -> loosened tolerance).
    x2d = x.reshape(2, 256)
    ref = jnp.maximum(x2d @ w1.T + b1, 0.0) @ w2.T + b2
    assert out.shape == (2, 1)
    assert jnp.allclose(out, ref, atol=2e-2, rtol=2e-2), (out, ref)

    print("KERNEL_OK")
</pallas_src>

<mosaic_0001>
module attributes {stable_mosaic.version = 11 : i64} {
  func.func @classifier_kernel(%arg0: i32, %arg1: memref<16x256xbf16, #tpu.memory_space<vmem>>, %arg2: memref<256x256xbf16, #tpu.memory_space<vmem>>, %arg3: memref<1x256xf32, #tpu.memory_space<vmem>>, %arg4: memref<1x256xf32, #tpu.memory_space<vmem>>, %arg5: memref<1x1xf32, #tpu.memory_space<vmem>>, %arg6: memref<16x128xf32, #tpu.memory_space<vmem>>) attributes {dimension_semantics = [#tpu.dimension_semantics<parallel>], iteration_bounds = array<i64: 1>, scalar_prefetch = 0 : i64, scratch_operands = 0 : i64, tpu.core_type = #tpu.core_type<tc>, window_params = [{transform_indices = @transform_0, window_bounds = array<i64: 16, 256>}, {pipeline_mode = #tpu.pipeline_mode<synchronous>, transform_indices = @transform_1, window_bounds = array<i64: 256, 256>}, {pipeline_mode = #tpu.pipeline_mode<synchronous>, transform_indices = @transform_2, window_bounds = array<i64: 1, 256>}, {pipeline_mode = #tpu.pipeline_mode<synchronous>, transform_indices = @transform_3, window_bounds = array<i64: 1, 256>}, {pipeline_mode = #tpu.pipeline_mode<synchronous>, transform_indices = @transform_4, window_bounds = array<i64: 1, 1>}, {transform_indices = @transform_5, window_bounds = array<i64: 16, 128>}]} {
    %c0 = arith.constant 0 : index
    %c0_0 = arith.constant 0 : index
    %0 = vector.load %arg1[%c0, %c0_0] : memref<16x256xbf16, #tpu.memory_space<vmem>>, vector<16x256xbf16>
    %c0_1 = arith.constant 0 : index
    %c0_2 = arith.constant 0 : index
    %1 = vector.load %arg2[%c0_1, %c0_2] : memref<256x256xbf16, #tpu.memory_space<vmem>>, vector<256x256xbf16>
    %cst = arith.constant dense<0.000000e+00> : vector<16x256xf32>
    %2 = tpu.matmul %0, %1, %cst {dimension_numbers = #tpu.dot_dimension_numbers<[1], [0], [0], [1], [0, 0, 1, 1], [], []>} : vector<16x256xbf16>, vector<256x256xbf16>, vector<16x256xf32> -> vector<16x256xf32>
    %c0_3 = arith.constant 0 : index
    %c0_4 = arith.constant 0 : index
    %3 = vector.load %arg3[%c0_3, %c0_4] : memref<1x256xf32, #tpu.memory_space<vmem>>, vector<1x256xf32>
    %4 = vector.broadcast %3 : vector<1x256xf32> to vector<16x256xf32>
    %5 = arith.addf %2, %4 : vector<16x256xf32>
    %cst_5 = arith.constant 0.000000e+00 : f32
    %6 = vector.broadcast %cst_5 : f32 to vector<16x256xf32>
    %7 = arith.maximumf %5, %6 : vector<16x256xf32>
    %c0_6 = arith.constant 0 : index
    %c0_7 = arith.constant 0 : index
    %8 = vector.load %arg4[%c0_6, %c0_7] : memref<1x256xf32, #tpu.memory_space<vmem>>, vector<1x256xf32>
    %9 = vector.broadcast %8 : vector<1x256xf32> to vector<16x256xf32>
    %10 = arith.mulf %7, %9 : vector<16x256xf32>
    %cst_8 = arith.constant dense<0.000000e+00> : vector<16xf32>
    %11 = vector.multi_reduction <add>, %10, %cst_8 [1] : vector<16x256xf32> to vector<16xf32>
    %12 = vector.shape_cast %11 : vector<16xf32> to vector<16x1xf32>
    %c0_9 = arith.constant 0 : index
    %c0_10 = arith.constant 0 : index
    %13 = vector.load %arg5[%c0_9, %c0_10] : memref<1x1xf32, #tpu.memory_space<vmem>>, vector<1x1xf32>
    %14 = vector.broadcast %13 : vector<1x1xf32> to vector<16x1xf32>
    %15 = arith.addf %12, %14 : vector<16x1xf32>
    %16 = vector.shape_cast %15 : vector<16x1xf32> to vector<16x1xf32>
    %17 = vector.broadcast %16 : vector<16x1xf32> to vector<16x128xf32>
    %c0_11 = arith.constant 0 : index
    %c0_12 = arith.constant 0 : index
    %18 = vector.load %arg6[%c0_11, %c0_12] : memref<16x128xf32, #tpu.memory_space<vmem>>, vector<16x128xf32>
    tpu.vector_store %arg6[%c0_11, %c0_12], %17 {strides = array<i32>} : memref<16x128xf32, #tpu.memory_space<vmem>>, vector<16x128xf32>,
    return
  }
  func.func @transform_0(%arg0: i32) -> (i32, i32) {
    %c0_i32 = arith.constant 0 : i32
    %c0_i32_0 = arith.constant 0 : i32
    return %arg0, %c0_i32 : i32, i32
  }
  func.func @transform_1(%arg0: i32) -> (i32, i32) {
    %c0_i32 = arith.constant 0 : i32
    %c0_i32_0 = arith.constant 0 : i32
    %c0_i32_1 = arith.constant 0 : i32
    return %c0_i32, %c0_i32_0 : i32, i32
  }
  func.func @transform_2(%arg0: i32) -> (i32, i32) {
    %c0_i32 = arith.constant 0 : i32
    %c0_i32_0 = arith.constant 0 : i32
    %c0_i32_1 = arith.constant 0 : i32
    return %c0_i32, %c0_i32_0 : i32, i32
  }
  func.func @transform_3(%arg0: i32) -> (i32, i32) {
    %c0_i32 = arith.constant 0 : i32
    %c0_i32_0 = arith.constant 0 : i32
    %c0_i32_1 = arith.constant 0 : i32
    return %c0_i32, %c0_i32_0 : i32, i32
  }
  func.func @transform_4(%arg0: i32) -> (i32, i32) {
    %c0_i32 = arith.constant 0 : i32
    %c0_i32_0 = arith.constant 0 : i32
    %c0_i32_1 = arith.constant 0 : i32
    return %c0_i32, %c0_i32_0 : i32, i32
  }
  func.func @transform_5(%arg0: i32) -> (i32, i32) {
    %c0_i32 = arith.constant 0 : i32
    %c0_i32_0 = arith.constant 0 : i32
    return %arg0, %c0_i32 : i32, i32
  }
}

</mosaic_0001>

<bundles_post_ra>
// kernel: classifier_forward.1
= control target key start
LH: loop header
LB: loop body
LE: loop exit
PB: predicated region body
PF: predicated region fallthrough
CT: control target
= control target key end

     0   :  { %s645_s0 = inlined_call_operand.vmem [shape: bf16[2,256], index: 0, kind: input, shape index: {}]   ;;  %s646_s1 = inlined_call_operand.hbm [shape: bf16[256,256], index: 1, kind: input, shape index: {}]   ;;  %s647_s2 = inlined_call_operand.vmem [shape: f32[1,256], index: 2, kind: input, shape index: {}]   ;;  %s648_s3 = inlined_call_operand.vmem [shape: f32[1,256], index: 3, kind: input, shape index: {}]   ;;  %s649_s4 = inlined_call_operand.<no memory space> [shape: f32[1,1], index: 4, kind: input, shape index: {}]   ;;  %s650_s5 = inlined_call_operand.vmem [shape: f32[2,128], index: 5, kind: output, shape index: {}]  }
   0x1   :  { %v10_v0 = vstv %s649_s4 }
   0x2   :  { %11 = vst [vmem:[#allocation2] sm:$0x1] %v10_v0 }
   0x3   :  { %12 = vsyncpa [#allocation4], 0  ;;  %s566_s20 = smov [#allocation3]  }
   0x4   :  { %s20_s21 = sshll.u32 %s566_s20, 4  ;;  %s21_s21 = int_to_ptr.vmem [resolvable:$true] %s20_s21 }
   0x5   :  { %s552_s22 = scalar_lea.vmem %s21_s21, 4096  ;;  %p557_p1 = scmp.lt.s32.totalorder %s21_s21, %s21_s21 }
   0x6   :  { %p553_p0 = scmp.ne.s32.totalorder %s21_s21, %s552_s22  ;;  %p558_p2 = scmp.lt.s32.totalorder %s552_s22, %s552_s22 }
   0x8   :  { %p559_p3 = por %p558_p2, %p557_p1 }
   0xa   :  { %p560_p4 = pnand %p559_p3, %p553_p0 }
   0xc   :  { %563 = shalt.err (!%p560_p4)
}
   0xd   :  { %s567_s23 = smov 128   ;;  %s568_s24 = smov 8  }
   0xe   :  { %26 = dma.hbm_to_vmem [thread:$0]  %s646_s1, 4096, %s21_s21, [#allocation4], %s567_s23, %s567_s23, %s568_s24  }
   0xf   :  { %564 = dma.done.wait [#allocation4], 4096  }
  0x10   :  { %565 = vsyncadd [#allocation4], 4294963200  ;;  %v496_v1 = vld [vmem:[#allocation3 + $0x74] ss:$8 sps:$4 sm:$0xff]   ;;  %v498_v2 = vld [vmem:[#allocation3 + $0x70] ss:$8 sps:$4 sm:$0xff]   ;;  %v78_v10 = vlaneseq }
  0x11   :  { %324 = vmatprep.subr.bf16.mxu0 %v496_v1  ;;  %v499_v3 = vld [vmem:[#allocation3 + $0x64] ss:$8 sps:$4 sm:$0xff]   ;;  %v501_v4 = vld [vmem:[#allocation3 + $0x60] ss:$8 sps:$4 sm:$0xff]   ;;  %v502_v5 = vld [vmem:[#allocation3 + $0x54] ss:$8 sps:$4 sm:$0xff]  }
  0x12   :  { %325 = vmatpush1.bf16.msra.mxu0 %v498_v2  ;;  %v504_v6 = vld [vmem:[#allocation3 + $0x50] ss:$8 sps:$4 sm:$0xff]   ;;  %v505_v7 = vld [vmem:[#allocation3 + $0x44] ss:$8 sps:$4 sm:$0xff]   ;;  %v507_v8 = vld [vmem:[#allocation3 + $0x40] ss:$8 sps:$4 sm:$0xff]  }
  0x13   :  { %326 = vmatprep.subr.bf16.mxu0 %v499_v3  ;;  %v508_v9 = vld [vmem:[#allocation3 + $0x34] ss:$8 sps:$4 sm:$0xff]   ;;  %v569_v11 = vmov 1966171168   ;;  %v510_v13 = vld [vmem:[#allocation3 + $0x30] ss:$8 sps:$4 sm:$0xff]  }
  0x14   :  { %v101_v12 = vunpack.c.l.s4 %v569_v11  ;;  %v511_v14 = vld [vmem:[#allocation3 + $0x24] ss:$8 sps:$4 sm:$0xff]   ;;  %v607_v15 = vshrl.u32 %v78_v10, 7  ;;  %v513_v17 = vld [vmem:[#allocation3 + $0x20] ss:$8 sps:$4 sm:$0xff]  }
  0x15   :  { %v514_v18 = vld [vmem:[#allocation3 + $0x14] ss:$8 sps:$4 sm:$0xff]   ;;  %v516_v20 = vld [vmem:[#allocation3 + $0x10] ss:$8 sps:$4 sm:$0xff]   ;;  %v37_v22 = vld [vmem:[%s645_s0 + $0x2] sm:$0x3] }
  0x16   :  { %327 = vmatpush1.bf16.msra.mxu0 %v501_v4  ;;  %v102_v16 = vunpack.c.0.s8 %v101_v12  ;;  %v36_v21 = vld [vmem:[%s645_s0] sm:$0x3]  ;;  %v38_v23 = vld [vmem:[%s645_s0 + $0x4] sm:$0x3]  ;;  %v39_v24 = vld [vmem:[%s645_s0 + $0x6] sm:$0x3] }
  0x17   :  { %328 = vmatprep.subr.bf16.mxu0 %v502_v5  ;;  %v40_v25 = vld [vmem:[%s645_s0 + $0x8] sm:$0x3]  ;;  %v96_v26 = vcombine.low %v36_v21, %v37_v22  ;;  %v41_v27 = vld [vmem:[%s645_s0 + $0xa] sm:$0x3]  ;;  %v42_v28 = vld [vmem:[%s645_s0 + $0xc] sm:$0x3]  ;;  %v97_v30 = vcombine.low %v38_v23, %v39_v24 }
  0x18   :  { %v105_v19 = vsub.s32 %v102_v16, %v607_v15  ;;  %v43_v29 = vld [vmem:[%s645_s0 + $0xe] sm:$0x3]  ;;  %v98_v32 = vcombine.low %v40_v25, %v41_v27  ;;  %v519_v38 = vld [vmem:[#allocation3] ss:$8 sps:$4 sm:$0xff]   ;;  %v520_v40 = vld [vmem:[#allocation3 + $0xf4] ss:$8 sps:$4 sm:$0xff]  }
  0x19   :  { %v517_v31 = vld [vmem:[#allocation3 + $0x4] ss:$8 sps:$4 sm:$0xff]   ;;  %v99_v33 = vcombine.low %v42_v28, %v43_v29  ;;  %v522_v44 = vld [vmem:[#allocation3 + $0xf0] ss:$8 sps:$4 sm:$0xff]   ;;  %v525_v47 = vld [vmem:[#allocation3 + $0xe0] ss:$8 sps:$4 sm:$0xff]  }
  0x1a   :  { %329 = vmatpush1.bf16.msra.mxu0 %v504_v6  ;;  %v106_v34 = vrot.slane %v96_v26, %v105_v19  ;;  %v113_v35 = vrot.slane %v97_v30, %v105_v19  ;;  %v120_v36 = vrot.slane %v98_v32, %v105_v19  ;;  %v523_v45 = vld [vmem:[#allocation3 + $0xe4] ss:$8 sps:$4 sm:$0xff]   ;;  %v526_v48 = vld [vmem:[#allocation3 + $0xd4] ss:$8 sps:$4 sm:$0xff]   ;;  %v528_v49 = vld [vmem:[#allocation3 + $0xd0] ss:$8 sps:$4 sm:$0xff]  }
  0x1b   :  { %330 = vmatprep.subr.bf16.mxu0 %v505_v7  ;;  %v127_v37 = vrot.slane %v99_v33, %v105_v19  ;;  %v529_v50 = vld [vmem:[#allocation3 + $0xc4] ss:$8 sps:$4 sm:$0xff]   ;;  %v531_v51 = vld [vmem:[#allocation3 + $0xc0] ss:$8 sps:$4 sm:$0xff]   ;;  %v532_v52 = vld [vmem:[#allocation3 + $0xb4] ss:$8 sps:$4 sm:$0xff]  }
  0x1c   :  { %v129_v39 = vcombine.high %v106_v34, %v113_v35  ;;  %v534_v53 = vld [vmem:[#allocation3 + $0xb0] ss:$8 sps:$4 sm:$0xff]   ;;  %v535_v54 = vld [vmem:[#allocation3 + $0xa4] ss:$8 sps:$4 sm:$0xff]   ;;  %v537_v55 = vld [vmem:[#allocation3 + $0xa0] ss:$8 sps:$4 sm:$0xff]   ;;  %v128_v57 = vcombine.low %v106_v34, %v113_v35 }
  0x1d   :  { %v131_v41 = vcombine.high %v120_v36, %v127_v37  ;;  %v538_v56 = vld [vmem:[#allocation3 + $0x94] ss:$8 sps:$4 sm:$0xff]   ;;  %v130_v58 = vcombine.low %v120_v36, %v127_v37  ;;  %v540_v59 = vld [vmem:[#allocation3 + $0x90] ss:$8 sps:$4 sm:$0xff]   ;;  %v541_v60 = vld [vmem:[#allocation3 + $0x84] ss:$8 sps:$4 sm:$0xff]  }
  0x1e   :  { %331 = vmatpush1.bf16.msra.mxu0 %v507_v8  ;;  %v145_v42 = vrot.slane %v129_v39, %v105_v19  ;;  %v138_v61 = vrot.slane %v128_v57, %v105_v19  ;;  %v543_v63 = vld [vmem:[#allocation3 + $0x80] ss:$8 sps:$4 sm:$0xff]   ;;  %v80_v1 = vsub.s32 0, %v607_v15  ;;  %v84_v3 = vsub.s32 1, %v607_v15  ;;  %v488_v28 = vld [vmem:[#allocation2] ss:$0 sm:$0xff] }
  0x1f   :  { %332 = vmatprep.subr.bf16.mxu0 %v508_v9  ;;  %v159_v43 = vrot.slane %v131_v41, %v105_v19  ;;  %v152_v62 = vrot.slane %v130_v58, %v105_v19  ;;  %v76_v2 = vld [vmem:[%s647_s2] sm:$0x3]  ;;  %v570_v27 = vmov 0  }
  0x20   :  { %v81_v4 = vrot.slane %v76_v2, %v80_v1  ;;  %v85_v5 = vrot.slane %v76_v2, %v84_v3  ;;  %v371_v7 = vld [vmem:[%s648_s3] sm:$0x3]  ;;  %494 = vset.pattern.permute.xlu1 %v570_v27  ;;  %495 = vset.pattern.permute.xlu0 %v570_v27 }
  0x21   :  { %v161_v46 = vcombine.low %v145_v42, %v159_v43  ;;  %v160_v0 = vcombine.low %v138_v61, %v152_v62  ;;  %v376_v12 = vrot.slane %v371_v7, %v80_v1 }
  0x22   :  { %333 = vmatpush1.bf16.msra.mxu0 %v510_v13  ;;  %v380_v13 = vrot.slane %v371_v7, %v84_v3 }
  0x23   :  { %334 = vmatprep.subr.bf16.mxu0 %v511_v14  ;;  %356 = vmatprep.mubr.bf16.mxu0 %v161_v46 }
  0x26   :  { %335 = vmatpush1.bf16.msra.mxu0 %v513_v17 }
  0x27   :  { %336 = vmatprep.subr.bf16.mxu0 %v514_v18 }
  0x2a   :  { %337 = vmatpush1.bf16.msra.mxu0 %v516_v20 }
  0x2b   :  { %338 = vmatprep.subr.bf16.mxu0 %v517_v31 }
  0x2e   :  { %339 = vmatpush1.bf16.msra.mxu0 %v519_v38 }
  0x2f   :  { %340 = vmatprep.subr.bf16.mxu0 %v520_v40 }
  0x32   :  { %341 = vmatpush2.bf16.msra.mxu0 %v522_v44 }
  0x33   :  { %342 = vmatprep.subr.bf16.mxu0 %v523_v45 }
  0x36   :  { %343 = vmatpush2.bf16.msra.mxu0 %v525_v47 }
  0x37   :  { %344 = vmatprep.subr.bf16.mxu0 %v526_v48 }
  0x3a   :  { %345 = vmatpush2.bf16.msra.mxu0 %v528_v49 }
  0x3b   :  { %346 = vmatprep.subr.bf16.mxu0 %v529_v50 }
  0x3e   :  { %347 = vmatpush2.bf16.msra.mxu0 %v531_v51 }
  0x3f   :  { %348 = vmatprep.subr.bf16.mxu0 %v532_v52 }
  0x42   :  { %349 = vmatpush2.bf16.msra.mxu0 %v534_v53 }
  0x43   :  { %350 = vmatprep.subr.bf16.mxu0 %v535_v54 }
  0x46   :  { %351 = vmatpush2.bf16.msra.mxu0 %v537_v55 }
  0x47   :  { %352 = vmatprep.subr.bf16.mxu0 %v538_v56 }
  0x4a   :  { %353 = vmatpush2.bf16.msra.mxu0 %v540_v59 }
  0x4b   :  { %354 = vmatprep.subr.bf16.mxu0 %v541_v60 }
  0x4e   :  { %355 = vmatpush2.bf16.msra.mxu0 %v543_v63 }
  0x51   :  { %357 = vmatmul.mubr.bf16.vlgmr.msra.gmra.mxu0 %v160_v0 }
 0x111   :  { %v358_v6 = vpop.f32.mrf.mxu0 }
 0x112   :  { %v359_v8 = vadd.f32 %v358_v6, %v81_v4 }
 0x113   :  { %v360_v9 = vpop.f32.mrf.mxu0 }
 0x114   :  { %v367_v10 = vmax.f32 %v359_v8, 0.0  ;;  %v361_v11 = vadd.f32 %v360_v9, %v85_v5 }
 0x115   :  { %v362_v14 = vpop.f32.mrf.mxu0 }
 0x116   :  { %v368_v16 = vmax.f32 %v361_v11, 0.0  ;;  %v363_v17 = vadd.f32 %v362_v14, %v81_v4  ;;  %v383_v15 = vmul.f32 %v376_v12, %v367_v10 }
 0x117   :  { %v364_v18 = vpop.f32.mrf.mxu0 }
 0x118   :  { %v369_v19 = vmax.f32 %v363_v17, 0.0  ;;  %v365_v20 = vadd.f32 %v364_v18, %v85_v5  ;;  %v384_v21 = vmul.f32 %v380_v13, %v368_v16 }
 0x11a   :  { %v370_v22 = vmax.f32 %v365_v20, 0.0  ;;  %v387_v23 = vadd.f32 %v384_v21, %v383_v15  ;;  %v385_v24 = vmul.f32 %v376_v12, %v369_v19 }
 0x11c   :  { %v386_v25 = vmul.f32 %v380_v13, %v370_v22  ;;  %388 = vadd.xlane.f32.xlu0 %v387_v23 }
 0x11e   :  { %v390_v26 = vadd.f32 %v386_v25, %v385_v24 }
 0x120   :  { %391 = vadd.xlane.f32.xlu0 %v390_v26 }
 0x1a5   :  { %v389_v29 = vpop.xlane.xlu0 %388 }
 0x1a6   :  { %v400_v30 = vadd.f32 %v488_v28, %v389_v29 }
 0x1a8   :  { %404 = vperm.xlu1 %494, %v400_v30  }
 0x1a9   :  { %v392_v31 = vpop.xlane.xlu0 %391 }
 0x1aa   :  { %v401_v32 = vadd.f32 %v488_v28, %v392_v31 }
 0x1ac   :  { %409 = vperm.xlu1 %494, %v401_v32  }
 0x223   :  { %v405_v33 = vpop.permute.xlu1 %404 }
 0x224   :  { %412 = vst [vmem:[#allocation5] sm:$0xff] %v405_v33 }
 0x227   :  { %v410_v34 = vpop.permute.xlu1 %409 }
 0x22b   :  { %v432_v35 = vld [vmem:[#allocation5] sm:$0x3] }
 0x22c   :  { %433 = vst [vmem:[%s650_s5] sm:$0x3] %v432_v35 }
 0x22d   :  { %451 = vsyncpa [#allocation4], 1 }

</bundles_post_ra>
